<compile_context>
chip_gen: v7x
topology: tpu7x:2x2x1
jax: 0.10.0
libtpu: 0.0.40
codegen_flags: <defaults>
</compile_context>

<pallas_src>
import jax
import jax.numpy as jnp
from jax.experimental import pallas as pl
from jax.experimental.pallas import tpu as pltpu

N_EMBD = 64
HIDDEN = 4 * N_EMBD  # 256


def _round_up(x, m):
    return ((x + m - 1) // m) * m


def ffn_kernel(x_ref, w1_ref, b1_ref, w2_ref, b2_ref, o_ref):
    # x_ref: (tm, n_embd) bf16 tile of tokens; weights are bf16, biases f32,
    # all fully resident in VMEM (constant index_map across the grid).
    x = x_ref[...]
    # First linear + ReLU: bf16 MXU matmul with f32 accumulation, bias/ReLU in f32.
    h = jnp.dot(x, w1_ref[...], preferred_element_type=jnp.float32) + b1_ref[...]
    h = jnp.maximum(h, 0.0)
    # Second linear: downcast activations to bf16 for the MXU, accumulate f32.
    y = jnp.dot(h.astype(w2_ref.dtype), w2_ref[...],
                preferred_element_type=jnp.float32) + b2_ref[...]
    # Dropout (eval mode) == identity.
    o_ref[...] = y.astype(o_ref.dtype)


def feed_forward_block(x, w1, b1, w2, b2, *, tm=512):
    """x: (M, n_embd) float32. Returns (M, n_embd) float32 (eval-mode forward)."""
    M, D = x.shape
    H = w1.shape[1]
    assert D == N_EMBD and H == HIDDEN

    # Effective row tile: large (default 512, multiple of 256) but never bigger than
    # needed for small M. Keep it a multiple of 16 so bf16 sublane packing is clean.
    tm_eff = min(tm, _round_up(max(M, 16), 16))
    m_pad = _round_up(M, tm_eff)

    x_p = x if m_pad == M else jnp.pad(x, ((0, m_pad - M), (0, 0)))

    # Cast matmul operands to bf16 once, in the wrapper (not per grid step).
    x_bf = x_p.astype(jnp.bfloat16)
    w1_bf = w1.astype(jnp.bfloat16)
    w2_bf = w2.astype(jnp.bfloat16)
    b1_f = b1.astype(jnp.float32)
    b2_f = b2.astype(jnp.float32)

    grid = (m_pad // tm_eff,)

    out = pl.pallas_call(
        ffn_kernel,
        out_shape=jax.ShapeDtypeStruct((m_pad, D), jnp.float32),
        grid_spec=pltpu.PrefetchScalarGridSpec(
            num_scalar_prefetch=0,
            grid=grid,
            in_specs=[
                pl.BlockSpec((tm_eff, D), lambda i: (i, 0)),  # x tile (bf16)
                pl.BlockSpec((D, H), lambda i: (0, 0)),       # W1 (full, bf16)
                pl.BlockSpec((1, H), lambda i: (0, 0)),       # b1 (f32)
                pl.BlockSpec((H, D), lambda i: (0, 0)),       # W2 (full, bf16)
                pl.BlockSpec((1, D), lambda i: (0, 0)),       # b2 (f32)
            ],
            out_specs=pl.BlockSpec((tm_eff, D), lambda i: (i, 0)),
        ),
        compiler_params=pltpu.CompilerParams(
            dimension_semantics=("parallel",)),  # shards grid across v7x's 2 TCs
    )(x_bf, w1_bf, b1_f, w2_bf, b2_f)

    return out[:M] if m_pad != M else out


def init_params(key, n_embd=N_EMBD):
    """Deterministic init mimicking nn.Linear default (uniform +/- 1/sqrt(fan_in))."""
    k1, k2, k3, k4 = jax.random.split(key, 4)
    hidden = 4 * n_embd
    bound1 = 1.0 / jnp.sqrt(n_embd)
    bound2 = 1.0 / jnp.sqrt(hidden)
    # stored as (in, out) so forward is x @ W + b
    w1 = jax.random.uniform(k1, (n_embd, hidden), jnp.float32, -bound1, bound1)
    b1 = jax.random.uniform(k2, (1, hidden), jnp.float32, -bound1, bound1)
    w2 = jax.random.uniform(k3, (hidden, n_embd), jnp.float32, -bound2, bound2)
    b2 = jax.random.uniform(k4, (1, n_embd), jnp.float32, -bound2, bound2)
    return w1, b1, w2, b2


if __name__ == "__main__":
    key = jax.random.PRNGKey(0)
    kx, kp = jax.random.split(key)

    B, T = 2, 8  # batch, sequence (small demo; real design point is thousands of tokens)
    x = jax.random.normal(kx, (B, T, N_EMBD), jnp.float32)
    w1, b1, w2, b2 = init_params(kp)

    # flatten tokens to rows for the kernel
    x2d = x.reshape(B * T, N_EMBD)
    out2d = feed_forward_block(x2d, w1, b1, w2, b2)
    out = out2d.reshape(B, T, N_EMBD)
    jax.block_until_ready(out)

    # Reference in plain JAX with the same bf16 casts (dropout eval mode == identity).
    xb = x2d.astype(jnp.bfloat16).astype(jnp.float32)
    w1b = w1.astype(jnp.bfloat16).astype(jnp.float32)
    w2b = w2.astype(jnp.bfloat16).astype(jnp.float32)
    ref = jnp.maximum(xb @ w1b + b1, 0.0) @ w2b + b2
    assert jnp.allclose(out2d, ref, atol=1e-2, rtol=1e-2), "mismatch vs reference"

    # Also sanity-check against the full-f32 reference with a looser (bf16-level) tolerance.
    ref_f32 = jnp.maximum(x2d @ w1 + b1, 0.0) @ w2 + b2
    assert jnp.allclose(out2d, ref_f32, atol=5e-2, rtol=5e-2), "mismatch vs f32 reference"

    print("KERNEL_OK")
</pallas_src>

<mosaic_0001>
module attributes {stable_mosaic.version = 11 : i64} {
  func.func @ffn_kernel(%arg0: i32, %arg1: memref<16x64xbf16, #tpu.memory_space<vmem>>, %arg2: memref<64x256xbf16, #tpu.memory_space<vmem>>, %arg3: memref<1x256xf32, #tpu.memory_space<vmem>>, %arg4: memref<256x64xbf16, #tpu.memory_space<vmem>>, %arg5: memref<1x64xf32, #tpu.memory_space<vmem>>, %arg6: memref<16x64xf32, #tpu.memory_space<vmem>>) attributes {dimension_semantics = [#tpu.dimension_semantics<parallel>], iteration_bounds = array<i64: 1>, scalar_prefetch = 0 : i64, scratch_operands = 0 : i64, tpu.core_type = #tpu.core_type<tc>, window_params = [{transform_indices = @transform_0, window_bounds = array<i64: 16, 64>}, {pipeline_mode = #tpu.pipeline_mode<synchronous>, transform_indices = @transform_1, window_bounds = array<i64: 64, 256>}, {pipeline_mode = #tpu.pipeline_mode<synchronous>, transform_indices = @transform_2, window_bounds = array<i64: 1, 256>}, {pipeline_mode = #tpu.pipeline_mode<synchronous>, transform_indices = @transform_3, window_bounds = array<i64: 256, 64>}, {pipeline_mode = #tpu.pipeline_mode<synchronous>, transform_indices = @transform_4, window_bounds = array<i64: 1, 64>}, {transform_indices = @transform_5, window_bounds = array<i64: 16, 64>}]} {
    %c0 = arith.constant 0 : index
    %c0_0 = arith.constant 0 : index
    %0 = vector.load %arg1[%c0, %c0_0] : memref<16x64xbf16, #tpu.memory_space<vmem>>, vector<16x64xbf16>
    %c0_1 = arith.constant 0 : index
    %c0_2 = arith.constant 0 : index
    %1 = vector.load %arg2[%c0_1, %c0_2] : memref<64x256xbf16, #tpu.memory_space<vmem>>, vector<64x256xbf16>
    %cst = arith.constant dense<0.000000e+00> : vector<16x256xf32>
    %2 = tpu.matmul %0, %1, %cst {dimension_numbers = #tpu.dot_dimension_numbers<[1], [0], [0], [1], [0, 0, 1, 1], [], []>} : vector<16x64xbf16>, vector<64x256xbf16>, vector<16x256xf32> -> vector<16x256xf32>
    %c0_3 = arith.constant 0 : index
    %c0_4 = arith.constant 0 : index
    %3 = vector.load %arg3[%c0_3, %c0_4] : memref<1x256xf32, #tpu.memory_space<vmem>>, vector<1x256xf32>
    %4 = vector.broadcast %3 : vector<1x256xf32> to vector<16x256xf32>
    %5 = arith.addf %2, %4 : vector<16x256xf32>
    %cst_5 = arith.constant 0.000000e+00 : f32
    %6 = vector.broadcast %cst_5 : f32 to vector<16x256xf32>
    %7 = arith.maximumf %5, %6 : vector<16x256xf32>
    %8 = arith.truncf %7 : vector<16x256xf32> to vector<16x256xbf16>
    %c0_6 = arith.constant 0 : index
    %c0_7 = arith.constant 0 : index
    %9 = vector.load %arg4[%c0_6, %c0_7] : memref<256x64xbf16, #tpu.memory_space<vmem>>, vector<256x64xbf16>
    %cst_8 = arith.constant dense<0.000000e+00> : vector<16x64xf32>
    %10 = tpu.matmul %8, %9, %cst_8 {dimension_numbers = #tpu.dot_dimension_numbers<[1], [0], [0], [1], [0, 0, 1, 1], [], []>} : vector<16x256xbf16>, vector<256x64xbf16>, vector<16x64xf32> -> vector<16x64xf32>
    %c0_9 = arith.constant 0 : index
    %c0_10 = arith.constant 0 : index
    %11 = vector.load %arg5[%c0_9, %c0_10] : memref<1x64xf32, #tpu.memory_space<vmem>>, vector<1x64xf32>
    %12 = vector.broadcast %11 : vector<1x64xf32> to vector<16x64xf32>
    %13 = arith.addf %10, %12 : vector<16x64xf32>
    %c0_11 = arith.constant 0 : index
    %c0_12 = arith.constant 0 : index
    %14 = vector.load %arg6[%c0_11, %c0_12] : memref<16x64xf32, #tpu.memory_space<vmem>>, vector<16x64xf32>
    tpu.vector_store %arg6[%c0_11, %c0_12], %13 {strides = array<i32>} : memref<16x64xf32, #tpu.memory_space<vmem>>, vector<16x64xf32>,
    return
  }
  func.func @transform_0(%arg0: i32) -> (i32, i32) {
    %c0_i32 = arith.constant 0 : i32
    %c0_i32_0 = arith.constant 0 : i32
    return %arg0, %c0_i32 : i32, i32
  }
  func.func @transform_1(%arg0: i32) -> (i32, i32) {
    %c0_i32 = arith.constant 0 : i32
    %c0_i32_0 = arith.constant 0 : i32
    %c0_i32_1 = arith.constant 0 : i32
    return %c0_i32, %c0_i32_0 : i32, i32
  }
  func.func @transform_2(%arg0: i32) -> (i32, i32) {
    %c0_i32 = arith.constant 0 : i32
    %c0_i32_0 = arith.constant 0 : i32
    %c0_i32_1 = arith.constant 0 : i32
    return %c0_i32, %c0_i32_0 : i32, i32
  }
  func.func @transform_3(%arg0: i32) -> (i32, i32) {
    %c0_i32 = arith.constant 0 : i32
    %c0_i32_0 = arith.constant 0 : i32
    %c0_i32_1 = arith.constant 0 : i32
    return %c0_i32, %c0_i32_0 : i32, i32
  }
  func.func @transform_4(%arg0: i32) -> (i32, i32) {
    %c0_i32 = arith.constant 0 : i32
    %c0_i32_0 = arith.constant 0 : i32
    %c0_i32_1 = arith.constant 0 : i32
    return %c0_i32, %c0_i32_0 : i32, i32
  }
  func.func @transform_5(%arg0: i32) -> (i32, i32) {
    %c0_i32 = arith.constant 0 : i32
    %c0_i32_0 = arith.constant 0 : i32
    return %arg0, %c0_i32 : i32, i32
  }
}

</mosaic_0001>

<bundles_post_ra>
// kernel: tpu_custom_call.1
= control target key start
LH: loop header
LB: loop body
LE: loop exit
PB: predicated region body
PF: predicated region fallthrough
CT: control target
= control target key end

     0   :  { %v442_v2 = vmov 0   ;;  %vm89_vm0 = vcmask 523264   ;;  %s572_s0 = inlined_call_operand.vmem [shape: bf16[16,64], index: 0, kind: input, shape index: {}]   ;;  %s573_s1 = inlined_call_operand.vmem [shape: bf16[64,256], index: 1, kind: input, shape index: {}]   ;;  %s574_s2 = inlined_call_operand.vmem [shape: f32[1,256], index: 2, kind: input, shape index: {}]   ;;  %s575_s3 = inlined_call_operand.vmem [shape: bf16[256,64], index: 3, kind: input, shape index: {}]   ;;  %s576_s4 = inlined_call_operand.vmem [shape: f32[1,64], index: 4, kind: input, shape index: {}]   ;;  %s577_s5 = inlined_call_operand.hbm [shape: f32[16,64], index: 5, kind: output, shape index: {}]  }
   0x1   :  { %v389_v0 = vld [vmem:[%s573_s1 + $0x4] ss:$8 sps:$4 sm:$0xff]   ;;  %v391_v1 = vld [vmem:[%s573_s1] ss:$8 sps:$4 sm:$0xff]   ;;  %125 = vmatprep.mubr.bf16.mxu0 %v442_v2  ;;  %v392_v3 = vld [vmem:[%s573_s1 + $0x14] ss:$8 sps:$4 sm:$0xff]  }
   0x2   :  { %93 = vmatprep.subr.bf16.mxu0 %v389_v0  ;;  %v394_v4 = vld [vmem:[%s573_s1 + $0x10] ss:$8 sps:$4 sm:$0xff]   ;;  %v395_v5 = vld [vmem:[%s573_s1 + $0x24] ss:$8 sps:$4 sm:$0xff]   ;;  %v397_v6 = vld [vmem:[%s573_s1 + $0x20] ss:$8 sps:$4 sm:$0xff]  }
   0x3   :  { %94 = vmatpush1.bf16.msra.mxu0 %v391_v1  ;;  %v398_v7 = vld [vmem:[%s573_s1 + $0x34] ss:$8 sps:$4 sm:$0xff]   ;;  %v402_v8 = vld [vmem:[%s575_s3 + $0x40] sm:$0xff]   ;;  %v400_v10 = vld [vmem:[%s573_s1 + $0x30] ss:$8 sps:$4 sm:$0xff]  }
   0x4   :  { %95 = vmatprep.subr.bf16.mxu0 %v392_v3  ;;  %v403_v9 = vld [vmem:[%s575_s3] sm:$0xff]   ;;  %363 = vmatprep.subr.bf16.mxu1 %v402_v8  ;;  %v404_v11 = vld [vmem:[%s575_s3 + $0x48] sm:$0xff]   ;;  %v406_v13 = vld [vmem:[%s575_s3 + $0x50] sm:$0xff]  }
   0x5   :  { %364 = vmatpush3.bf16.msra.mxu1 %v403_v9  ;;  %v405_v12 = vld [vmem:[%s575_s3 + $0x8] sm:$0xff]   ;;  %v401_v14 = vld [vmem:[%s572_s0] sm:$0xff]   ;;  %v407_v15 = vld [vmem:[%s575_s3 + $0x10] sm:$0xff]  }
   0x6   :  { %365 = vmatprep.subr.bf16.mxu1 %v404_v11  ;;  %v408_v16 = vld [vmem:[%s575_s3 + $0x58] sm:$0xff]   ;;  %v410_v18 = vld [vmem:[%s575_s3 + $0x60] sm:$0xff]  }
   0x7   :  { %96 = vmatpush1.bf16.msra.mxu0 %v394_v4  ;;  %v409_v17 = vld [vmem:[%s575_s3 + $0x18] sm:$0xff]  }
   0x8   :  { %97 = vmatprep.subr.bf16.mxu0 %v395_v5 }
   0x9   :  { %366 = vmatpush3.bf16.msra.mxu1 %v405_v12 }
   0xa   :  { %367 = vmatprep.subr.bf16.mxu1 %v406_v13 }
   0xb   :  { %98 = vmatpush1.bf16.msra.mxu0 %v397_v6 }
   0xc   :  { %99 = vmatprep.subr.bf16.mxu0 %v398_v7 }
   0xd   :  { %368 = vmatpush3.bf16.msra.mxu1 %v407_v15 }
   0xe   :  { %369 = vmatprep.subr.bf16.mxu1 %v408_v16 }
   0xf   :  { %100 = vmatpush1.bf16.msra.mxu0 %v400_v10 }
  0x12   :  { %345 = vmatmul.mubr.msk.bf16.vlgmr.msra.gmra.mrb[0].mxu0 %vm89_vm0, %v401_v14 }
  0x13   :  { %10 = vsyncpa [#allocation3], 0  ;;  %370 = vmatpush3.bf16.msra.mxu1 %v409_v17  ;;  %v411_v19 = vld [vmem:[%s575_s3 + $0x20] sm:$0xff]   ;;  %v412_v20 = vld [vmem:[%s575_s3 + $0x68] sm:$0xff]   ;;  %v34_v26 = vlaneseq  ;;  %s443_s18 = smov [#allocation2]  }
  0x14   :  { %371 = vmatprep.subr.bf16.mxu1 %v410_v18  ;;  %v413_v21 = vld [vmem:[%s575_s3 + $0x28] sm:$0xff]   ;;  %v414_v22 = vld [vmem:[%s575_s3 + $0x70] sm:$0xff]   ;;  %v416_v24 = vld [vmem:[%s575_s3 + $0x78] sm:$0xff]   ;;  %s325_s19 = sshll.u32 %s443_s18, 4  ;;  %s326_s19 = int_to_ptr.vmem [resolvable:$true] %s325_s19 }
  0x15   :  { %v415_v23 = vld [vmem:[%s575_s3 + $0x30] sm:$0xff]   ;;  %v417_v25 = vld [vmem:[%s575_s3 + $0x38] sm:$0xff]   ;;  %v35_v27 = vshrl.u32 %v34_v26, 7  ;;  %v32_v29 = vld [vmem:[%s574_s2] sm:$0x3]  ;;  %s418_s20 = scalar_lea.vmem %s326_s19, 256  ;;  %p423_p1 = scmp.lt.s32.totalorder %s326_s19, %s326_s19 }
  0x16   :  { %v346_v48 = vld [vmem:[%s576_s4] ss:$0 sm:$0xff]  ;;  %p419_p0 = scmp.ne.s32.totalorder %s326_s19, %s418_s20  ;;  %p424_p2 = scmp.lt.s32.totalorder %s418_s20, %s418_s20 }
  0x17   :  { %372 = vmatpush3.bf16.msra.mxu1 %v411_v19  ;;  %v36_v28 = vsub.s32 0, %v35_v27  ;;  %v40_v30 = vsub.s32 1, %v35_v27 }
  0x18   :  { %373 = vmatprep.subr.bf16.mxu1 %v412_v20  ;;  %p425_p3 = por %p424_p2, %p423_p1 }
  0x19   :  { %v37_v31 = vrot.slane %v32_v29, %v36_v28  ;;  %v41_v32 = vrot.slane %v32_v29, %v40_v30 }
  0x1a   :  { %p426_p4 = pnand %p425_p3, %p419_p0 }
  0x1b   :  { %374 = vmatpush3.bf16.msra.mxu1 %v413_v21 }
  0x1c   :  { %375 = vmatprep.subr.bf16.mxu1 %v414_v22 }
  0x1f   :  { %376 = vmatpush3.bf16.msra.mxu1 %v415_v23 }
  0x20   :  { %377 = vmatprep.subr.bf16.mxu1 %v416_v24 }
  0x23   :  { %378 = vmatpush3.bf16.msra.mxu1 %v417_v25 }
  0xe5   :  { %v127_v33 = vpop.f32.mrb[0].mxu0 }
  0xe6   :  { %v128_v34 = vadd.f32 %v127_v33, %v37_v31  ;;  %v129_v35 = vpop.f32.mrb[1].mxu0 }
  0xe7   :  { %v130_v36 = vadd.f32 %v129_v35, %v41_v32  ;;  %v131_v37 = vpop.f32.mrb[2].mxu0 }
  0xe8   :  { %v132_v38 = vadd.f32 %v131_v37, %v37_v31  ;;  %v133_v39 = vpop.f32.mrb[3].mxu0  ;;  %v136_v41 = vmax.f32 %v128_v34, 0.0 }
  0xe9   :  { %v134_v40 = vadd.f32 %v133_v39, %v41_v32  ;;  %v137_v43 = vmax.f32 %v130_v36, 0.0 }
  0xea   :  { %v138_v42 = vmax.f32 %v132_v38, 0.0 }
  0xeb   :  { %v139_v44 = vmax.f32 %v134_v40, 0.0 }
  0xec   :  { %v140_v45 = vpack.c.bf16 %v138_v42, %v136_v41 }
  0xed   :  { %v141_v46 = vpack.c.bf16 %v139_v44, %v137_v43 }
  0xef   :  { %309 = vmatprep.mubr.bf16.mxu1 %v141_v46 }
  0xf0   :  { %310 = vmatmul.mubr.bf16.vlgmr.msra.gmra.mrb[0].mxu1 %v140_v45 }
 0x1c3   :  { %v379_v47 = vpop.f32.mrb[0].mxu1 }
 0x1c4   :  { %v380_v49 = vpop.f32.mrb[1].mxu1 }
 0x1c5   :  { %v381_v50 = vadd.f32 %v380_v49, %v379_v47  ;;  %v382_v51 = vpop.f32.mrb[2].mxu1 }
 0x1c6   :  { %v383_v52 = vpop.f32.mrb[3].mxu1 }
 0x1c7   :  { %v312_v53 = vadd.f32 %v381_v50, %v346_v48  ;;  %v384_v54 = vadd.f32 %v383_v52, %v382_v51 }
 0x1c9   :  { %318 = vst.msk [vmem:[#allocation2] sm:$0xff] %vm89_vm0, %v312_v53  ;;  %v315_v55 = vadd.f32 %v384_v54, %v346_v48 }
 0x1cb   :  { %319 = vst.msk [vmem:[#allocation2 + $0x8] sm:$0xff] %vm89_vm0, %v315_v55 }
 0x1cc   :  { %429 = shalt.err (!%p426_p4)
}
 0x1cd   :  { %s430_s21 = scalar_lea.hbm %s577_s5, 256 }
 0x1ce   :  { %p431_p5 = scmp.ne.s32.totalorder %s577_s5, %s430_s21  ;;  %p434_p6 = scmp.lt.u32.totalorder %s430_s21, %s577_s5 }
 0x1d0   :  { %p436_p7 = pnand %p434_p6, %p431_p5 }
 0x1d2   :  { %439 = shalt.err (!%p436_p7)
}
 0x1d3   :  { %s444_s26 = smov 128   ;;  %s445_s27 = smov 8  }
 0x1d4   :  { %331 = dma.vmem_to_hbm [thread:$0]  %s326_s19, 256, %s577_s5, [#allocation3], %s444_s26, %s444_s26, %s445_s27  }
 0x1d5   :  { %440 = dma.done.wait [#allocation3], 256  }
 0x1d6   :  { %441 = vsyncadd [#allocation3], 4294967040 }
 0x1d7   :  { %335 = vsyncpa [#allocation3], 1 }

</bundles_post_ra>
